<compile_context>
chip_gen: v7x
topology: tpu7x:2x2x1
jax: 0.10.0
libtpu: 0.0.40
codegen_flags: <defaults>
</compile_context>

<pallas_src>
import jax
import jax.numpy as jnp
from jax import lax
from jax.experimental import pallas as pl
from jax.experimental.pallas import tpu as pltpu

THRESHOLD = 0.5
NEG_POS_RATIO = 2
ALPHA = 1.0


# ------------------------- box helpers (plain JAX glue) -------------------------
def cxcy_to_xy(cxcy):
    return jnp.concatenate(
        [cxcy[..., :2] - cxcy[..., 2:] / 2.0, cxcy[..., :2] + cxcy[..., 2:] / 2.0],
        axis=-1)


def pred_to_boxes(gcxgcy, priors_cxcy):
    # standard SSD decode: offsets w.r.t. priors -> (cx, cy, w, h)
    return jnp.concatenate(
        [gcxgcy[..., :2] * priors_cxcy[..., 2:] / 10.0 + priors_cxcy[..., :2],
         jnp.exp(gcxgcy[..., 2:] / 5.0) * priors_cxcy[..., 2:]],
        axis=-1)


# ------------- Pallas kernel 1: fused pairwise IoU + matching reductions ----------
def iou_match_kernel(boxes_ref, priors_ref, ofp_val_ref, ofp_arg_ref, pfo_arg_ref):
    bx = boxes_ref[0]                       # (NO_pad, 4)  xy boxes of one image
    p = priors_ref[...]                     # (4, NP)      xy priors (transposed)
    no_pad = bx.shape[0]
    n_priors = p.shape[1]

    b_xmin = bx[:, 0:1]
    b_ymin = bx[:, 1:2]
    b_xmax = bx[:, 2:3]
    b_ymax = bx[:, 3:4]                     # (NO_pad, 1)
    p_xmin = p[0:1, :]
    p_ymin = p[1:2, :]
    p_xmax = p[2:3, :]
    p_ymax = p[3:4, :]                      # (1, NP)

    iw = jnp.maximum(jnp.minimum(b_xmax, p_xmax) - jnp.maximum(b_xmin, p_xmin), 0.0)
    ih = jnp.maximum(jnp.minimum(b_ymax, p_ymax) - jnp.maximum(b_ymin, p_ymin), 0.0)
    inter = iw * ih                         # (NO_pad, NP)
    area_b = (b_xmax - b_xmin) * (b_ymax - b_ymin)
    area_p = (p_xmax - p_xmin) * (p_ymax - p_ymin)
    union = area_b + area_p - inter
    # real boxes always have union > 0; the guard only protects zero-padded rows
    iou = inter / jnp.where(union > 0.0, union, 1.0)

    # per-prior: best object (reduce over sublanes).  First-index tie-break
    # matches jnp.argmax; zero-padded box rows (IoU == 0) never beat a real row
    # on a tie because real rows have smaller indices.
    ofp_v = jnp.max(iou, axis=0, keepdims=True)                         # (1, NP)
    obj_idx = lax.broadcasted_iota(jnp.int32, iou.shape, 0).astype(jnp.float32)
    ofp_a = jnp.min(jnp.where(iou == ofp_v, obj_idx, float(no_pad)),
                    axis=0, keepdims=True)
    ofp_val_ref[0] = ofp_v
    ofp_arg_ref[0] = ofp_a.astype(jnp.int32)

    # per-object: best prior (reduce over lanes), first-index tie-break.
    pfo_v = jnp.max(iou, axis=1, keepdims=True)                         # (NO_pad, 1)
    pri_idx = lax.broadcasted_iota(jnp.int32, iou.shape, 1).astype(jnp.float32)
    pfo_a = jnp.min(jnp.where(iou == pfo_v, pri_idx, float(n_priors)),
                    axis=1, keepdims=True)
    pfo_arg_ref[0] = pfo_a.astype(jnp.int32)


def iou_match(boxes_pad, priors_xy_t):
    B, NO_pad, _ = boxes_pad.shape
    _, NP = priors_xy_t.shape
    return pl.pallas_call(
        iou_match_kernel,
        out_shape=(jax.ShapeDtypeStruct((B, 1, NP), jnp.float32),   # max IoU / prior
                   jax.ShapeDtypeStruct((B, 1, NP), jnp.int32),     # argmax obj / prior
                   jax.ShapeDtypeStruct((B, NO_pad, 1), jnp.int32)),  # argmax prior / obj
        grid=(B,),
        in_specs=[
            pl.BlockSpec((1, NO_pad, 4), lambda b: (b, 0, 0)),
            pl.BlockSpec((4, NP), lambda b: (0, 0)),
        ],
        out_specs=(pl.BlockSpec((1, 1, NP), lambda b: (b, 0, 0)),
                   pl.BlockSpec((1, 1, NP), lambda b: (b, 0, 0)),
                   pl.BlockSpec((1, NO_pad, 1), lambda b: (b, 0, 0))),
        compiler_params=pltpu.CompilerParams(
            dimension_semantics=("parallel",)),
    )(boxes_pad, priors_xy_t)


# ------------- Pallas kernel 2: per-prior CE + L1 (natural layouts) --------------
def ce_l1_kernel(scores_ref, classes_ref, ploc_ref, tloc_ref, ce_ref, l1_ref):
    s = scores_ref[0]                                    # (NP, C) f32
    cls = classes_ref[0]                                 # (NP, 1) int32
    m = jnp.max(s, axis=1, keepdims=True)                # (NP, 1)
    lse = m + jnp.log(jnp.sum(jnp.exp(s - m), axis=1, keepdims=True))
    class_iota = lax.broadcasted_iota(jnp.int32, s.shape, 1)
    tgt = jnp.sum(jnp.where(class_iota == cls, s, 0.0), axis=1, keepdims=True)
    ce_ref[0] = lse - tgt                                # per-element CE, (NP, 1)
    l1_ref[0] = jnp.sum(jnp.abs(ploc_ref[0] - tloc_ref[0]), axis=1, keepdims=True)


def ce_and_l1(scores, classes3, pred_locs, true_locs):
    B, NP, C = scores.shape
    return pl.pallas_call(
        ce_l1_kernel,
        out_shape=(jax.ShapeDtypeStruct((B, NP, 1), jnp.float32),
                   jax.ShapeDtypeStruct((B, NP, 1), jnp.float32)),
        grid=(B,),
        in_specs=[
            pl.BlockSpec((1, NP, C), lambda b: (b, 0, 0)),
            pl.BlockSpec((1, NP, 1), lambda b: (b, 0, 0)),
            pl.BlockSpec((1, NP, 4), lambda b: (b, 0, 0)),
            pl.BlockSpec((1, NP, 4), lambda b: (b, 0, 0)),
        ],
        out_specs=(pl.BlockSpec((1, NP, 1), lambda b: (b, 0, 0)),
                   pl.BlockSpec((1, NP, 1), lambda b: (b, 0, 0))),
        compiler_params=pltpu.CompilerParams(
            dimension_semantics=("parallel",)),
    )(scores, classes3, pred_locs, true_locs)


# ------------------------------- full BoxLoss forward -----------------------------
def box_loss(predicted_locs, predicted_scores, boxes, labels, priors_cxcy,
             threshold=THRESHOLD, neg_pos_ratio=NEG_POS_RATIO, alpha=ALPHA):
    B, NP, _ = predicted_locs.shape
    NO = boxes.shape[1]
    priors_xy = cxcy_to_xy(priors_cxcy)                 # (NP, 4)
    priors_xy_t = jnp.transpose(priors_xy)              # (4, NP) tiny one-time transpose

    # pad object dim to a sublane multiple; padded rows have IoU == 0 everywhere
    NO_pad = max(8, ((NO + 7) // 8) * 8)
    boxes_pad = jnp.zeros((B, NO_pad, 4), jnp.float32).at[:, :NO, :].set(boxes)

    ofp_val, ofp_arg, pfo_arg = iou_match(boxes_pad, priors_xy_t)
    overlap_for_each_prior = ofp_val[:, 0, :]           # (B, NP)
    object_for_each_prior = ofp_arg[:, 0, :]            # (B, NP) int32
    prior_for_each_object = pfo_arg[:, :NO, 0]          # (B, NO) int32

    # ---- match finalization (data-dependent scatter/gather, plain JAX) ----
    def match(ofp_i, obj_i, pfo_i, boxes_i, labels_i):
        obj_i = obj_i.at[pfo_i].set(jnp.arange(NO))
        ofp_i = ofp_i.at[pfo_i].set(1.0)
        label_i = labels_i[obj_i]
        label_i = jnp.where(ofp_i < threshold, 0, label_i)
        true_locs_i = cxcy_to_xy(pred_to_boxes(boxes_i[obj_i], priors_cxcy))
        return label_i.astype(jnp.int32), true_locs_i

    true_classes, true_locs = jax.vmap(match)(
        overlap_for_each_prior, object_for_each_prior, prior_for_each_object,
        boxes, labels)

    # ---- per-prior cross-entropy + L1 via Pallas (no wrapper transposes) ----
    conf3, l13 = ce_and_l1(predicted_scores, true_classes[..., None],
                           predicted_locs, true_locs)
    conf_loss_all = conf3[..., 0]                        # (B, NP)
    l1_per_prior = l13[..., 0]                           # (B, NP)

    positive = true_classes != 0
    n_positives = jnp.sum(positive, axis=1)
    n_pos_total = jnp.sum(n_positives)

    # nn.L1Loss() = mean over the selected elements (= 4 * total positives)
    locs_loss = jnp.sum(jnp.where(positive, l1_per_prior, 0.0)) / (
        4.0 * n_pos_total.astype(jnp.float32))

    conf_loss_pos_sum = jnp.sum(jnp.where(positive, conf_loss_all, 0.0))
    conf_loss_neg = jnp.where(positive, 0.0, conf_loss_all)
    # TODO(synk): an exact lax.top_k replacement for this full descending sort
    # needs a static bound on positives-per-image; without one the sort is kept
    # so hard-negative selection matches the PyTorch semantics for any input.
    conf_loss_neg = -jnp.sort(-conf_loss_neg, axis=1)
    ranks = jnp.arange(NP)[None, :]
    hard_neg = ranks < (neg_pos_ratio * n_positives)[:, None]
    conf_loss_hard_neg_sum = jnp.sum(jnp.where(hard_neg, conf_loss_neg, 0.0))
    conf_loss = (conf_loss_hard_neg_sum + conf_loss_pos_sum) / (
        n_pos_total.astype(jnp.float32) + 1e-6)

    return conf_loss + alpha * locs_loss


# ---------------------------- pure-JAX reference (check) --------------------------
def box_loss_reference(predicted_locs, predicted_scores, boxes, labels, priors_cxcy,
                       threshold=THRESHOLD, neg_pos_ratio=NEG_POS_RATIO, alpha=ALPHA):
    B, NP, _ = predicted_locs.shape
    NO = boxes.shape[1]
    priors_xy = cxcy_to_xy(priors_cxcy)

    def iou(b, p):
        lo = jnp.maximum(b[:, None, :2], p[None, :, :2])
        hi = jnp.minimum(b[:, None, 2:], p[None, :, 2:])
        wh = jnp.clip(hi - lo, 0.0)
        inter = wh[..., 0] * wh[..., 1]
        ab = (b[:, 2] - b[:, 0]) * (b[:, 3] - b[:, 1])
        ap = (p[:, 2] - p[:, 0]) * (p[:, 3] - p[:, 1])
        return inter / (ab[:, None] + ap[None, :] - inter)

    def match(boxes_i, labels_i):
        ov = iou(boxes_i, priors_xy)
        ofp = jnp.max(ov, 0)
        obj = jnp.argmax(ov, 0)
        pfo = jnp.argmax(ov, 1)
        obj = obj.at[pfo].set(jnp.arange(NO))
        ofp = ofp.at[pfo].set(1.0)
        lab = labels_i[obj]
        lab = jnp.where(ofp < threshold, 0, lab)
        tl = cxcy_to_xy(pred_to_boxes(boxes_i[obj], priors_cxcy))
        return lab.astype(jnp.int32), tl

    true_classes, true_locs = jax.vmap(match)(boxes, labels)
    positive = true_classes != 0
    n_pos = jnp.sum(positive, axis=1)
    n_pos_total = jnp.sum(n_pos)
    l1 = jnp.sum(jnp.abs(predicted_locs - true_locs), axis=-1)
    locs_loss = jnp.sum(jnp.where(positive, l1, 0.0)) / (
        4.0 * n_pos_total.astype(jnp.float32))
    logp = jax.nn.log_softmax(predicted_scores, axis=-1)
    ce = -jnp.take_along_axis(logp, true_classes[..., None], axis=-1)[..., 0]
    pos_sum = jnp.sum(jnp.where(positive, ce, 0.0))
    neg = jnp.where(positive, 0.0, ce)
    neg = -jnp.sort(-neg, axis=1)
    ranks = jnp.arange(NP)[None, :]
    hard = ranks < (neg_pos_ratio * n_pos)[:, None]
    hard_sum = jnp.sum(jnp.where(hard, neg, 0.0))
    conf_loss = (hard_sum + pos_sum) / (n_pos_total.astype(jnp.float32) + 1e-6)
    return conf_loss + alpha * locs_loss


if __name__ == "__main__":
    key = jax.random.PRNGKey(0)
    B, NP, C, NO = 2, 256, 8, 3

    # deterministic priors: 16x16 grid of (cx, cy, w, h)
    g = (jnp.arange(16, dtype=jnp.float32) + 0.5) / 16.0
    cy, cx = jnp.meshgrid(g, g, indexing="ij")
    priors_cxcy = jnp.stack(
        [cx.ravel(), cy.ravel(),
         jnp.full((NP,), 0.15, jnp.float32),
         jnp.full((NP,), 0.15, jnp.float32)], axis=1)

    k1, k2, k3, k4 = jax.random.split(key, 4)
    predicted_locs = jax.random.normal(k1, (B, NP, 4), jnp.float32) * 0.1
    predicted_scores = jax.random.normal(k2, (B, NP, C), jnp.float32)
    ctr = jax.random.uniform(k3, (B, NO, 2), jnp.float32, minval=0.25, maxval=0.75)
    sz = jax.random.uniform(k4, (B, NO, 2), jnp.float32, minval=0.15, maxval=0.35)
    boxes = jnp.concatenate([ctr - sz / 2.0, ctr + sz / 2.0], axis=-1)   # xy format
    labels = ((jnp.arange(B * NO).reshape(B, NO) % (C - 1)) + 1).astype(jnp.int32)

    loss = box_loss(predicted_locs, predicted_scores, boxes, labels, priors_cxcy)
    loss = jax.block_until_ready(loss)

    ref = box_loss_reference(predicted_locs, predicted_scores, boxes, labels,
                             priors_cxcy)
    ref = jax.block_until_ready(ref)
    assert jnp.isfinite(loss), "loss is not finite"
    assert jnp.allclose(loss, ref, rtol=2e-3, atol=1e-4), (loss, ref)
    print("KERNEL_OK")
</pallas_src>

<mosaic_0001>
module attributes {stable_mosaic.version = 11 : i64} {
  func.func @iou_match_kernel(%arg0: i32, %arg1: memref<1x8x4xf32, #tpu.memory_space<vmem>>, %arg2: memref<4x256xf32, #tpu.memory_space<vmem>>, %arg3: memref<1x1x256xf32, #tpu.memory_space<vmem>>, %arg4: memref<1x1x256xi32, #tpu.memory_space<vmem>>, %arg5: memref<1x8x1xi32, #tpu.memory_space<vmem>>) attributes {dimension_semantics = [#tpu.dimension_semantics<parallel>], iteration_bounds = array<i64: 2>, scalar_prefetch = 0 : i64, scratch_operands = 0 : i64, tpu.core_type = #tpu.core_type<tc>, window_params = [{transform_indices = @transform_0, window_bounds = array<i64: 1, 8, 4>}, {pipeline_mode = #tpu.pipeline_mode<synchronous>, transform_indices = @transform_1, window_bounds = array<i64: 4, 256>}, {transform_indices = @transform_2, window_bounds = array<i64: 1, 1, 256>}, {transform_indices = @transform_3, window_bounds = array<i64: 1, 1, 256>}, {transform_indices = @transform_4, window_bounds = array<i64: 1, 8, 1>}]} {
    %c0 = arith.constant 0 : index
    %c0_0 = arith.constant 0 : index
    %c0_1 = arith.constant 0 : index
    %0 = vector.load %arg1[%c0, %c0_0, %c0_1] : memref<1x8x4xf32, #tpu.memory_space<vmem>>, vector<1x8x4xf32>
    %1 = vector.shape_cast %0 : vector<1x8x4xf32> to vector<8x4xf32>
    %c0_2 = arith.constant 0 : index
    %c0_3 = arith.constant 0 : index
    %2 = vector.load %arg2[%c0_2, %c0_3] : memref<4x256xf32, #tpu.memory_space<vmem>>, vector<4x256xf32>
    %3 = vector.extract_strided_slice %1 {offsets = [0, 0], sizes = [8, 1], strides = [1, 1]} : vector<8x4xf32> to vector<8x1xf32>
    %4 = vector.extract_strided_slice %1 {offsets = [0, 1], sizes = [8, 1], strides = [1, 1]} : vector<8x4xf32> to vector<8x1xf32>
    %5 = vector.extract_strided_slice %1 {offsets = [0, 2], sizes = [8, 1], strides = [1, 1]} : vector<8x4xf32> to vector<8x1xf32>
    %6 = vector.extract_strided_slice %1 {offsets = [0, 3], sizes = [8, 1], strides = [1, 1]} : vector<8x4xf32> to vector<8x1xf32>
    %7 = vector.extract_strided_slice %2 {offsets = [0, 0], sizes = [1, 256], strides = [1, 1]} : vector<4x256xf32> to vector<1x256xf32>
    %8 = vector.extract_strided_slice %2 {offsets = [1, 0], sizes = [1, 256], strides = [1, 1]} : vector<4x256xf32> to vector<1x256xf32>
    %9 = vector.extract_strided_slice %2 {offsets = [2, 0], sizes = [1, 256], strides = [1, 1]} : vector<4x256xf32> to vector<1x256xf32>
    %10 = vector.extract_strided_slice %2 {offsets = [3, 0], sizes = [1, 256], strides = [1, 1]} : vector<4x256xf32> to vector<1x256xf32>
    %11 = vector.broadcast %5 : vector<8x1xf32> to vector<8x256xf32>
    %12 = vector.broadcast %9 : vector<1x256xf32> to vector<8x256xf32>
    %13 = arith.minimumf %11, %12 : vector<8x256xf32>
    %14 = vector.broadcast %3 : vector<8x1xf32> to vector<8x256xf32>
    %15 = vector.broadcast %7 : vector<1x256xf32> to vector<8x256xf32>
    %16 = arith.maximumf %14, %15 : vector<8x256xf32>
    %17 = arith.subf %13, %16 : vector<8x256xf32>
    %cst = arith.constant 0.000000e+00 : f32
    %18 = vector.broadcast %cst : f32 to vector<8x256xf32>
    %19 = arith.maximumf %17, %18 : vector<8x256xf32>
    %20 = vector.broadcast %6 : vector<8x1xf32> to vector<8x256xf32>
    %21 = vector.broadcast %10 : vector<1x256xf32> to vector<8x256xf32>
    %22 = arith.minimumf %20, %21 : vector<8x256xf32>
    %23 = vector.broadcast %4 : vector<8x1xf32> to vector<8x256xf32>
    %24 = vector.broadcast %8 : vector<1x256xf32> to vector<8x256xf32>
    %25 = arith.maximumf %23, %24 : vector<8x256xf32>
    %26 = arith.subf %22, %25 : vector<8x256xf32>
    %cst_4 = arith.constant 0.000000e+00 : f32
    %27 = vector.broadcast %cst_4 : f32 to vector<8x256xf32>
    %28 = arith.maximumf %26, %27 : vector<8x256xf32>
    %29 = arith.mulf %19, %28 : vector<8x256xf32>
    %30 = arith.subf %5, %3 : vector<8x1xf32>
    %31 = arith.subf %6, %4 : vector<8x1xf32>
    %32 = arith.mulf %30, %31 : vector<8x1xf32>
    %33 = arith.subf %9, %7 : vector<1x256xf32>
    %34 = arith.subf %10, %8 : vector<1x256xf32>
    %35 = arith.mulf %33, %34 : vector<1x256xf32>
    %36 = vector.broadcast %32 : vector<8x1xf32> to vector<8x256xf32>
    %37 = vector.broadcast %35 : vector<1x256xf32> to vector<8x256xf32>
    %38 = arith.addf %36, %37 : vector<8x256xf32>
    %39 = arith.subf %38, %29 : vector<8x256xf32>
    %cst_5 = arith.constant 0.000000e+00 : f32
    %40 = vector.broadcast %cst_5 : f32 to vector<8x256xf32>
    %41 = arith.cmpf ogt, %39, %40 : vector<8x256xf32>
    %cst_6 = arith.constant 1.000000e+00 : f32
    %42 = vector.broadcast %cst_6 : f32 to vector<8x256xf32>
    %43 = arith.select %41, %39, %42 : vector<8x256xi1>, vector<8x256xf32>
    %44 = arith.divf %29, %43 : vector<8x256xf32>
    %cst_7 = arith.constant dense<0xFF800000> : vector<256xf32>
    %45 = vector.multi_reduction <maximumf>, %44, %cst_7 [0] : vector<8x256xf32> to vector<256xf32>
    %46 = vector.shape_cast %45 : vector<256xf32> to vector<1x256xf32>
    %47 = tpu.iota {dimensions = array<i32: 0>} : vector<8x256xi32>
    %48 = arith.sitofp %47 : vector<8x256xi32> to vector<8x256xf32>
    %49 = vector.broadcast %46 : vector<1x256xf32> to vector<8x256xf32>
    %50 = arith.cmpf oeq, %44, %49 : vector<8x256xf32>
    %cst_8 = arith.constant 8.000000e+00 : f32
    %51 = vector.broadcast %cst_8 : f32 to vector<8x256xf32>
    %52 = arith.select %50, %48, %51 : vector<8x256xi1>, vector<8x256xf32>
    %cst_9 = arith.constant dense<0x7F800000> : vector<256xf32>
    %53 = vector.multi_reduction <minimumf>, %52, %cst_9 [0] : vector<8x256xf32> to vector<256xf32>
    %54 = vector.shape_cast %53 : vector<256xf32> to vector<1x256xf32>
    %c0_10 = arith.constant 0 : index
    %c0_11 = arith.constant 0 : index
    %c0_12 = arith.constant 0 : index
    %55 = vector.load %arg3[%c0_10, %c0_11, %c0_12] : memref<1x1x256xf32, #tpu.memory_space<vmem>>, vector<1x1x256xf32>
    %56 = vector.shape_cast %55 : vector<1x1x256xf32> to vector<1x256xf32>
    %57 = vector.shape_cast %46 : vector<1x256xf32> to vector<1x1x256xf32>
    tpu.vector_store %arg3[%c0_10, %c0_11, %c0_12], %57 {strides = array<i32>} : memref<1x1x256xf32, #tpu.memory_space<vmem>>, vector<1x1x256xf32>,
    %58 = arith.fptosi %54 : vector<1x256xf32> to vector<1x256xi32>
    %c0_13 = arith.constant 0 : index
    %c0_14 = arith.constant 0 : index
    %c0_15 = arith.constant 0 : index
    %59 = vector.load %arg4[%c0_13, %c0_14, %c0_15] : memref<1x1x256xi32, #tpu.memory_space<vmem>>, vector<1x1x256xi32>
    %60 = vector.shape_cast %59 : vector<1x1x256xi32> to vector<1x256xi32>
    %61 = vector.shape_cast %58 : vector<1x256xi32> to vector<1x1x256xi32>
    tpu.vector_store %arg4[%c0_13, %c0_14, %c0_15], %61 {strides = array<i32>} : memref<1x1x256xi32, #tpu.memory_space<vmem>>, vector<1x1x256xi32>,
    %cst_16 = arith.constant dense<0xFF800000> : vector<8xf32>
    %62 = vector.multi_reduction <maximumf>, %44, %cst_16 [1] : vector<8x256xf32> to vector<8xf32>
    %63 = vector.shape_cast %62 : vector<8xf32> to vector<8x1xf32>
    %64 = tpu.iota {dimensions = array<i32: 1>} : vector<8x256xi32>
    %65 = arith.sitofp %64 : vector<8x256xi32> to vector<8x256xf32>
    %66 = vector.broadcast %63 : vector<8x1xf32> to vector<8x256xf32>
    %67 = arith.cmpf oeq, %44, %66 : vector<8x256xf32>
    %cst_17 = arith.constant 2.560000e+02 : f32
    %68 = vector.broadcast %cst_17 : f32 to vector<8x256xf32>
    %69 = arith.select %67, %65, %68 : vector<8x256xi1>, vector<8x256xf32>
    %cst_18 = arith.constant dense<0x7F800000> : vector<8xf32>
    %70 = vector.multi_reduction <minimumf>, %69, %cst_18 [1] : vector<8x256xf32> to vector<8xf32>
    %71 = vector.shape_cast %70 : vector<8xf32> to vector<8x1xf32>
    %72 = arith.fptosi %71 : vector<8x1xf32> to vector<8x1xi32>
    %c0_19 = arith.constant 0 : index
    %c0_20 = arith.constant 0 : index
    %c0_21 = arith.constant 0 : index
    %73 = vector.load %arg5[%c0_19, %c0_20, %c0_21] : memref<1x8x1xi32, #tpu.memory_space<vmem>>, vector<1x8x1xi32>
    %74 = vector.shape_cast %73 : vector<1x8x1xi32> to vector<8x1xi32>
    %75 = vector.shape_cast %72 : vector<8x1xi32> to vector<1x8x1xi32>
    tpu.vector_store %arg5[%c0_19, %c0_20, %c0_21], %75 {strides = array<i32>} : memref<1x8x1xi32, #tpu.memory_space<vmem>>, vector<1x8x1xi32>,
    return
  }
  func.func @transform_0(%arg0: i32) -> (i32, i32, i32) {
    %c0_i32 = arith.constant 0 : i32
    %c0_i32_0 = arith.constant 0 : i32
    %c0_i32_1 = arith.constant 0 : i32
    return %arg0, %c0_i32, %c0_i32_0 : i32, i32, i32
  }
  func.func @transform_1(%arg0: i32) -> (i32, i32) {
    %c0_i32 = arith.constant 0 : i32
    %c0_i32_0 = arith.constant 0 : i32
    %c0_i32_1 = arith.constant 0 : i32
    return %c0_i32, %c0_i32_0 : i32, i32
  }
  func.func @transform_2(%arg0: i32) -> (i32, i32, i32) {
    %c0_i32 = arith.constant 0 : i32
    %c0_i32_0 = arith.constant 0 : i32
    %c0_i32_1 = arith.constant 0 : i32
    return %arg0, %c0_i32, %c0_i32_0 : i32, i32, i32
  }
  func.func @transform_3(%arg0: i32) -> (i32, i32, i32) {
    %c0_i32 = arith.constant 0 : i32
    %c0_i32_0 = arith.constant 0 : i32
    %c0_i32_1 = arith.constant 0 : i32
    return %arg0, %c0_i32, %c0_i32_0 : i32, i32, i32
  }
  func.func @transform_4(%arg0: i32) -> (i32, i32, i32) {
    %c0_i32 = arith.constant 0 : i32
    %c0_i32_0 = arith.constant 0 : i32
    %c0_i32_1 = arith.constant 0 : i32
    return %arg0, %c0_i32, %c0_i32_0 : i32, i32, i32
  }
}

</mosaic_0001>

<bundles_post_ra>
// kernel: tpu_custom_call.1
= control target key start
LH: loop header
LB: loop body
LE: loop exit
PB: predicated region body
PF: predicated region fallthrough
CT: control target
= control target key end

     0   :  { %10 = vsyncpa [#allocation3], 0  ;;  %s1008_s0 = inlined_call_operand.vmem [shape: f32[2,8,4], index: 0, kind: input, shape index: {}]   ;;  %s1009_s1 = inlined_call_operand.vmem [shape: f32[4,256], index: 1, kind: input, shape index: {}]   ;;  %s1010_s2 = inlined_call_operand.hbm [shape: f32[2,1,256], index: 2, kind: output, shape index: {0}]   ;;  %s1011_s3 = inlined_call_operand.hbm [shape: s32[2,1,256], index: 3, kind: output, shape index: {1}]   ;;  %s1012_s4 = inlined_call_operand.vmem [shape: s32[2,8,1], index: 4, kind: output, shape index: {2}]  }
   0x1   :  { %12 = vsyncpa [#allocation3 + $0x1], 0 }
   0x2   :  { %13 = vsyncpa [#allocation5], 0 }
   0x3   :  { %15 = vsyncpa [#allocation5 + $0x1], 0  ;;  %s839_s15 = smov 0   ;;  %s841_s16 = smov 0  }
   0x4   :  { %s843_s17 = smov 0   ;;  %s845_s18 = smov 0  }
   0x5 LB: > { %s860_s19 = sadd.s32 4294967295, %s803_s18   ;;  %s623_s20 = sadd.s32 4294967294, %s803_s18   ;;  %s803_s18 = sphi %s845_s18, %s1020_s18   ;;  %s799_s17 = sphi %s843_s17, %s1019_s17   ;;  %s795_s16 = sphi %s841_s16, %s1018_s16   ;;  %s791_s15 = sphi %s839_s15, %s1017_s15  }
   0x6   : > { %s864_s21 = sadd.s32 1, %s803_s18   ;;  %s75_s22 = sadd.s32 1, %s799_s17 }
   0x7   : > { %s72_s23 = ssub.s32 %s803_s18, %s864_s21  ;;  %p85_p0 = scmp.ne.s32.totalorder %s799_s17, %s795_s16 }
   0x8   : > { %p73_p1 = scmp.eq.s32.totalorder %s72_s23, 0  ;;  %p86_p2 = scmp.eq.s32.totalorder %s860_s19, 1 }
   0x9   : > { %p91_p3 = scmp.ne.s32.totalorder %s795_s16, %s791_s15  ;;  %p92_p4 = scmp.eq.s32.totalorder %s623_s20, 1 }
   0xa   : > { %s875_s24 = scalar_select %p73_p1, %s799_s17, %s75_s22  }
   0xb   : > { %p877_p5 = por %p86_p2, %p85_p0  ;;  %p881_p6 = por %p92_p4, %p91_p3 }
   0xc   : > { %p626_p7 = scmp.ge.s32.totalorder %s803_s18, 1  ;;  %p172_p8 = scmp.lt.s32.totalorder %s803_s18, 3 }
   0xe   : > { %p173_p9 = pnand %p626_p7, %p172_p8 }
   0xf   : > { %p206_p10 = scmp.lt.s32.totalorder (!%p173_p9), %s860_s19, 1  ;;  %v805_v0 = vmov (!%p173_p9), 2   ;;  %v806_v1 = vmov (!%p173_p9), 3   ;;  %s807_s6 = smov (!%p173_p9), 2   ;;  %v808_v3 = vmov (!%p173_p9), 0   ;;  %v809_v4 = vmov (!%p173_p9), 1  }
  0x10   : > { %176 = sbr.rel (%p173_p9) target bundleno = 705 (0x2c1), region = 28  ;;  %699 = vset.pattern.permute.xlu1 (!%p173_p9), %v805_v0  ;;  %701 = vset.pattern.permute.xlu0 (!%p173_p9), %v806_v1  ;;  %s810_s7 = smov (!%p173_p9), 127   ;;  %v222_v9 = vlaneseq (!%p173_p9)  ;;  %v215_v12 = vld [vmem:[%s1009_s1] sm:$0xff] (!%p173_p9) }
  0x11   : > { %v333_v17 = vrot.slane (!%p173_p9), %v215_v12, 6  ;;  %s913_s10 = sand.u32 (!%p173_p9), 1, %s795_s16   ;;  %s640_s14 = sshll.u32 (!%p173_p9), %s860_s19, 5 }
  0x12   : > { %v898_v10 = vshrl.u32 (!%p173_p9), %v222_v9, 7  ;;  %s627_s11 = sshll.u32 (!%p173_p9), %s913_s10, 1  ;;  %vm918_vm4 = vcmp.lt.s32.totalorder (!%p173_p9), %v222_v9, 256  ;;  %s940_s29 = scalar_lea.hbm (!%p173_p9), %s1010_s2, %s640_s14 }
  0x13   : > { %v335_v27 = vsub.f32 (!%p173_p9), %v215_v12, %v333_v17  ;;  %s922_s12 = scalar_lea.vmem (!%p173_p9), [#allocation2], %s627_s11  ;;  %s927_s13 = scalar_lea.vmem (!%p173_p9), [#allocation4], %s627_s11 }
  0x14   : > { %v224_v13 = vsub.s32 (!%p173_p9), 2, %v898_v10  ;;  %v228_v14 = vsub.s32 (!%p173_p9), 6, %v898_v10  ;;  %v248_v15 = vsub.s32 (!%p173_p9), 0, %v898_v10  ;;  %v252_v16 = vsub.s32 (!%p173_p9), 4, %v898_v10  ;;  %s491_s20 = sshll.u32 (!%p173_p9), %s922_s12, 4  ;;  %s468_s30 = scalar_lea.sflag (!%p173_p9), [#allocation3], %s913_s10  ;;  %s492_s20 = int_to_ptr.vmem [resolvable:$true] %s491_s20 }
  0x15   : > { %v300_v18 = vsub.s32 (!%p173_p9), 1, %v898_v10  ;;  %v304_v19 = vsub.s32 (!%p173_p9), 5, %v898_v10  ;;  %v276_v20 = vsub.s32 (!%p173_p9), 3, %v898_v10  ;;  %v280_v21 = vsub.s32 (!%p173_p9), 7, %v898_v10 }
  0x16   : > { %v225_v22 = vrot.slane (!%p173_p9), %v215_v12, %v224_v13  ;;  %v229_v23 = vrot.slane (!%p173_p9), %v215_v12, %v228_v14  ;;  %v249_v24 = vrot.slane (!%p173_p9), %v215_v12, %v248_v15  ;;  %v253_v25 = vrot.slane (!%p173_p9), %v215_v12, %v252_v16 }
  0x17   : > { %s889_s27 = scalar_select %p206_p10, %s860_s19, 1  ;;  %v301_v28 = vrot.slane %v215_v12, %v300_v18  ;;  %v305_v29 = vrot.slane %v215_v12, %v304_v19  ;;  %v277_v30 = vrot.slane %v215_v12, %v276_v20  ;;  %v281_v31 = vrot.slane %v215_v12, %v280_v21 }
  0x18   : > { %v235_v32 = vrot.slane %v225_v22, %v224_v13  ;;  %v239_v33 = vrot.slane %v229_v23, %v224_v13  ;;  %v259_v34 = vrot.slane %v249_v24, %v248_v15  ;;  %v263_v35 = vrot.slane %v253_v25, %v248_v15 }
  0x19   : > { %s629_s28 = sshll.u32 %s889_s27, 3  ;;  %v631_v36 = vrot.slane %v335_v27, 9  ;;  %v311_v37 = vrot.slane %v301_v28, %v300_v18  ;;  %v315_v38 = vrot.slane %v305_v29, %v300_v18  ;;  %v287_v39 = vrot.slane %v277_v30, %v276_v20 }
  0x1a   : > { %s209_s5 = scalar_lea.vmem %s1008_s0, %s629_s28  ;;  %v291_v40 = vrot.slane %v281_v31, %v276_v20  ;;  %v811_v20 = vmov 1966171168   ;;  %v391_v29 = vcvt.s32.f32 %v898_v10 }
  0x1b   : > { %v214_v2 = vld [vmem:[%s209_s5] sm:$0xff]  ;;  %v340_v47 = vmul.f32 %v631_v36, %v335_v27  ;;  %v412_v21 = vunpack.c.l.s4 %v811_v20  ;;  %s709_s5 = scalar_lea.vmem %s492_s20, 32 }
  0x1c   : > { %324 = vrot.lane.b32.xlu0 %v214_v2, %s807_s6  ;;  %218 = vperm.xlu1 %699, %v214_v2   ;;  %p710_p11 = scmp.ne.s32.totalorder %s492_s20, %s709_s5  ;;  %s812_s6 = smov [#allocation2]  }
  0x1d   : > { %v350_v52 = vrot.slane %v340_v47, %v224_v13  ;;  %v354_v53 = vrot.slane %v340_v47, %v228_v14 }
  0x1e   : > { %p711_p12 = pnand %p710_p11, %p877_p5 }
  0x1f   : > { %v360_v58 = vrot.slane %v350_v52, %v224_v13  ;;  %v364_v59 = vrot.slane %v354_v53, %v224_v13 }
  0x20   : > { %700 = vset.pattern.permute.xlu1 %v808_v3  ;;  %p712_p13 = pneg %p711_p12 }
  0x21   : > { %243 = vperm.xlu1 %700, %v214_v2  }
  0x25   : > { %702 = vset.pattern.permute.xlu1 %v809_v4 }
  0x26   : > { %295 = vperm.xlu1 %702, %v214_v2  }
  0x2a   : > { %703 = vset.pattern.permute.xlu1 %v805_v0 }
  0x8e   : > { %v325_v5 = vpop.permute.xlu0 %324 }
  0x8f   : > { %v327_v6 = vsub.f32 %v214_v2, %v325_v5 }
  0x91   : > { %329 = vrot.lane.b32.xlu0 %v327_v6, %s810_s7  ;;  %s713_s7 = sshll.u32 %s812_s6, 4  ;;  %s714_s7 = int_to_ptr.vmem [resolvable:$false] %s713_s7 }
  0x92   : > { %s715_s8 = scalar_lea.vmem %s714_s7, 64  ;;  %p716_p0 = scmp.lt.s32.totalorder %s492_s20, %s714_s7 }
  0x93   : > { %p717_p1 = scmp.lt.s32.totalorder %s715_s8, %s709_s5 }
  0x95   : > { %271 = vperm.xlu0 %701, %v214_v2   ;;  %p718_p2 = por %p717_p1, %p716_p0 }
  0x97   : > { %p719_p3 = pnand %p718_p2, %p712_p13 }
  0x99   : > { %704 = vset.pattern.permute.xlu0 %v805_v0 }
  0x9b   : > { %v219_v11 = vpop.permute.xlu1 %218 }
  0x9c   : > { %v240_v43 = vmin.f32 %v219_v11, %v235_v32  ;;  %v241_v44 = vmin.f32 %v219_v11, %v239_v33 }
  0xa0   : > { %v244_v26 = vpop.permute.xlu1 %243 }
  0xa1   : > { %v264_v45 = vmax.f32 %v244_v26, %v259_v34  ;;  %v265_v46 = vmax.f32 %v244_v26, %v263_v35  ;;  %v413_v26 = vunpack.c.0.s8 %v412_v21 }
  0xa3   : > { %v266_v54 = vsub.f32 %v240_v43, %v264_v45  ;;  %v267_v55 = vsub.f32 %v241_v44, %v265_v46  ;;  %v416_v32 = vsub.s32 %v413_v26, %v898_v10 }
  0xa5   : > { %v296_v41 = vpop.permute.xlu1 %295  ;;  %v268_v60 = vmax.f32 %v266_v54, 0.0  ;;  %v269_v61 = vmax.f32 %v267_v55, 0.0 }
  0xa6   : > { %v316_v48 = vmax.f32 %v296_v41, %v311_v37  ;;  %v317_v49 = vmax.f32 %v296_v41, %v315_v38 }
 0x103   : > { %v330_v7 = vpop.permute.xlu0 %329 }
 0x104   : > { %v332_v8 = vmul.f32 %v330_v7, %v327_v6 }
 0x106   : > { %343 = vperm.xlu1 %703, %v332_v8  }
 0x114   : > { %v272_v42 = vpop.permute.xlu0 %271 }
 0x115   : > { %v292_v50 = vmin.f32 %v272_v42, %v287_v39  ;;  %v293_v51 = vmin.f32 %v272_v42, %v291_v40 }
 0x117   : > { %v318_v56 = vsub.f32 %v292_v50, %v316_v48  ;;  %v319_v57 = vsub.f32 %v293_v51, %v317_v49 }
 0x119   : > { %v320_v62 = vmax.f32 %v318_v56, 0.0  ;;  %v321_v63 = vmax.f32 %v319_v57, 0.0  ;;  %v453_v57 = vand.u32 127, %v222_v9 }
 0x11b   : > { %v322_v1 = vmul.f32 %v320_v62, %v268_v60  ;;  %v323_v2 = vmul.f32 %v321_v63, %v269_v61 }
 0x185   : > { %v344_v0 = vpop.permute.xlu1 %343 }
 0x186   : > { %v365_v3 = vadd.f32 %v360_v58, %v344_v0  ;;  %v366_v4 = vadd.f32 %v364_v59, %v344_v0  ;;  %v454_v58 = vadd.s32 128, %v453_v57  ;;  %v455_v59 = vcvt.s32.f32 %v453_v57 }
 0x188   : > { %v367_v5 = vsub.f32 %v365_v3, %v322_v1  ;;  %v368_v6 = vsub.f32 %v366_v4, %v323_v2  ;;  %v456_v60 = vcvt.s32.f32 %v454_v58 }
 0x18a   : > { %vm369_vm0 = vcmp.gt.f32.partialorder %v367_v5, 0.0  ;;  %vm370_vm1 = vcmp.gt.f32.partialorder %v368_v6, 0.0 }
 0x18b   : > { %v371_v7 = vsel %vm369_vm0, %v367_v5, 1.0  ;;  %v372_v8 = vsel %vm370_vm1, %v368_v6, 1.0 }
 0x18c   : > { %705 = vrcp.f32 %v371_v7 }
 0x18d   : > { %707 = vrcp.f32 %v372_v8 }
 0x196   : > { %v706_v11 = vpop.eup %705 }
 0x197   : > { %v708_v12 = vpop.eup %707  ;;  %v374_v13 = vmul.f32 %v706_v11, %v322_v1 }
 0x198   : > { %v376_v14 = vmul.f32 %v708_v12, %v323_v2 }
 0x199   : > { %v377_v15 = vrot.slane %v374_v13, 4 }
 0x19a   : > { %v449_v16 = vmax.f32 %v374_v13, %v376_v14  ;;  %v383_v17 = vrot.slane %v376_v14, 4 }
 0x19b   : > { %v378_v18 = vmax.f32 %v374_v13, %v377_v15 }
 0x19c   : > { %450 = vmax.xlane.f32.xlu0 %v449_v16  ;;  %v384_v19 = vmax.f32 %v376_v14, %v383_v17 }
 0x19d   : > { %v379_v22 = vrot.slane %v378_v18, 2 }
 0x19e   : > { %v385_v23 = vrot.slane %v384_v19, 2 }
 0x19f   : > { %v380_v24 = vmax.f32 %v378_v18, %v379_v22 }
 0x1a0   : > { %v386_v25 = vmax.f32 %v384_v19, %v385_v23 }
 0x1a1   : > { %v381_v27 = vrot.slane %v380_v24, 1 }
 0x1a2   : > { %v387_v28 = vrot.slane %v386_v25, 1 }
 0x1a3   : > { %v382_v30 = vmax.f32 %v380_v24, %v381_v27 }
 0x1a4   : > { %v388_v31 = vmax.f32 %v386_v25, %v387_v28 }
 0x1a5   : > { %vm392_vm2 = vcmp.eq.f32.partialorder %v374_v13, %v382_v30 }
 0x1a6   : > { %vm393_vm3 = vcmp.eq.f32.partialorder %v376_v14, %v388_v31  ;;  %v394_v33 = vsel %vm392_vm2, %v391_v29, 8.0  ;;  %v410_v34 = vcombine.low %v382_v30, %v388_v31 }
 0x1a7   : > { %v395_v35 = vsel %vm393_vm3, %v391_v29, 8.0  ;;  %v396_v36 = vrot.slane %v394_v33, 4 }
 0x1a8   : > { %v402_v37 = vrot.slane %v395_v35, 4  ;;  %v417_v38 = vrot.slane %v410_v34, %v416_v32 }
 0x1a9   : > { %v397_v39 = vmin.f32 %v394_v33, %v396_v36 }
 0x1aa   : > { %v403_v41 = vmin.f32 %v395_v35, %v402_v37  ;;  %v424_v42 = vrot.slane %v417_v38, %v416_v32 }
 0x1ab   : > { %v398_v43 = vrot.slane %v397_v39, 2 }
 0x1ac   : > { %430 = vst.msk [vmem:[%s922_s12] sm:$0x3] %vm918_vm4, %v424_v42  ;;  %v404_v10 = vrot.slane %v403_v41, 2 }
 0x1ad   : > { %v399_v44 = vmin.f32 %v397_v39, %v398_v43 }
 0x1ae   : > { %v405_v45 = vmin.f32 %v403_v41, %v404_v10 }
 0x1af   : > { %v400_v46 = vrot.slane %v399_v44, 1 }
 0x1b0   : > { %v406_v47 = vrot.slane %v405_v45, 1 }
 0x1b1   : > { %v401_v48 = vmin.f32 %v399_v44, %v400_v46 }
 0x1b2   : > { %v407_v49 = vmin.f32 %v405_v45, %v406_v47 }
 0x1b3   : > { %v642_v50 = vtrunc.f32 %v401_v48 }
 0x1b4   : > { %v644_v51 = vtrunc.f32 %v407_v49 }
 0x1b5   : > { %v643_v52 = vcvt.f32.s32 %v642_v50 }
 0x1b6   : > { %v645_v53 = vcvt.f32.s32 %v644_v51 }
 0x1b8   : > { %v433_v54 = vcombine.low %v643_v52, %v645_v53 }
 0x1ba   : > { %v440_v55 = vrot.slane %v433_v54, %v416_v32 }
 0x1bc   : > { %v447_v56 = vrot.slane %v440_v55, %v416_v32 }
 0x1be   : > { %448 = vst.msk [vmem:[%s927_s13] sm:$0x3] %vm918_vm4, %v447_v56 }
 0x229   : > { %v451_v61 = vpop.xlane.xlu0 %450 }
 0x22a   : > { %vm457_vm5 = vcmp.eq.f32.partialorder %v374_v13, %v451_v61  ;;  %vm458_vm6 = vcmp.eq.f32.partialorder %v376_v14, %v451_v61 }
 0x22b   : > { %v459_v62 = vsel %vm457_vm5, %v455_v59, 256.0  ;;  %v460_v63 = vsel %vm458_vm6, %v456_v60, 256.0 }
 0x22c   : > { %v461_v0 = vmin.f32 %v459_v62, %v460_v63 }
 0x22e   : > { %462 = vmin.xlane.f32.xlu1 %v461_v0 }
 0x22f   : > { %722 = shalt.err (!%p719_p3)
}
 0x230   : > { %s723_s9 = scalar_lea.hbm %s940_s29, 32  ;;  %s727_s22 = scalar_lea.hbm %s1010_s2, 64 }
 0x231   : > { %p724_p4 = scmp.ne.s32.totalorder %s940_s29, %s723_s9  ;;  %p728_p9 = scmp.lt.u32.totalorder %s940_s29, %s1010_s2 }
 0x232   : > { %p729_p10 = scmp.lt.u32.totalorder %s727_s22, %s723_s9  ;;  %p731_p12 = scmp.lt.u32.totalorder %s723_s9, %s940_s29 }
 0x233   : > { %p725_p7 = pnand %p724_p4, %p877_p5 }
 0x234   : > { %p730_p11 = por %p729_p10, %p728_p9 }
 0x235   : > { %p726_p8 = pneg %p725_p7 }
 0x236   : > { %p732_p13 = por %p731_p12, %p730_p11 }
 0x238   : > { %p733_p0 = pnand %p732_p13, %p726_p8 }
 0x23a   : > { %736 = shalt.err (!%p733_p0)
}
 0x23b   : > { %648 = dma.vmem_to_hbm [thread:$0]  (%p877_p5), %s492_s20, 32, %s940_s29, %s468_s30  }
 0x23c   : > { %s965_s8 = scalar_lea.hbm %s1011_s3, %s640_s14  ;;  %s505_s11 = sshll.u32 %s927_s13, 4  ;;  %s506_s11 = int_to_ptr.vmem [resolvable:$true] %s505_s11 }
 0x23d   : > { %s473_s9 = scalar_lea.sflag [#allocation5], %s913_s10  ;;  %s737_s12 = scalar_lea.vmem %s506_s11, 32 }
 0x23e   : > { %p738_p1 = scmp.ne.s32.totalorder %s506_s11, %s737_s12  ;;  %s813_s22 = smov [#allocation4]  }
 0x23f   : > { %s741_s23 = sshll.u32 %s813_s22, 4  ;;  %s742_s23 = int_to_ptr.vmem [resolvable:$false] %s741_s23 }
 0x240   : > { %p739_p2 = pnand %p738_p1, %p877_p5  ;;  %s743_s6 = scalar_lea.vmem %s742_s23, 64 }
 0x241   : > { %p744_p4 = scmp.lt.s32.totalorder %s506_s11, %s742_s23  ;;  %p745_p7 = scmp.lt.s32.totalorder %s743_s6, %s737_s12 }
 0x242   : > { %p740_p3 = pneg %p739_p2 }
 0x243   : > { %p746_p8 = por %p745_p7, %p744_p4 }
 0x245   : > { %p747_p9 = pnand %p746_p8, %p740_p3 }
 0x247   : > { %750 = shalt.err (!%p747_p9)
}
 0x248   : > { %s751_s19 = scalar_lea.hbm %s965_s8, 32  ;;  %s755_s14 = scalar_lea.hbm %s1011_s3, 64 }
 0x249   : > { %p752_p10 = scmp.ne.s32.totalorder %s965_s8, %s751_s19  ;;  %p756_p13 = scmp.lt.u32.totalorder %s965_s8, %s1011_s3 }
 0x24a   : > { %p757_p0 = scmp.lt.u32.totalorder %s755_s14, %s751_s19  ;;  %p759_p2 = scmp.lt.u32.totalorder %s751_s19, %s965_s8 }
 0x24b   : > { %p753_p11 = pnand %p752_p10, %p877_p5 }
 0x24c   : > { %p758_p1 = por %p757_p0, %p756_p13 }
 0x24d   : > { %p754_p12 = pneg %p753_p11 }
 0x24e   : > { %p760_p3 = por %p759_p2, %p758_p1 }
 0x250   : > { %p761_p4 = pnand %p760_p3, %p754_p12 }
 0x252   : > { %764 = shalt.err (!%p761_p4)
}
 0x253   : > { %649 = dma.vmem_to_hbm [thread:$0]  (%p877_p5), %s506_s11, 32, %s965_s8, %s473_s9   ;;  %vm465_vm7 = vcmask 7168  }
 0x254   : > { %s213_s7 = scalar_lea.vmem %s1012_s4, %s629_s28 }
 0x2bb   : > { %v463_v9 = vpop.xlane.xlu1 %462 }
 0x2bc   : > { %v646_v1 = vtrunc.f32 %v463_v9 }
 0x2be   : > { %v647_v2 = vcvt.f32.s32 %v646_v1 }
 0x2c0   : > { %466 = vst.msk [vmem:[%s213_s7] sm:$0xff] %vm465_vm7, %v647_v2 }
 0x2c1 PF: > { %p659_p7 = scmp.ge.s32.totalorder %s803_s18, 2  ;;  %s520_s12 = sand.u32 1, %s791_s15  }
 0x2c2   : > { %s521_s25 = scalar_lea.sflag [#allocation3], %s520_s12 }
 0x2c3   : > { %p653_p8 = pnand %p659_p7, %p881_p6 }
 0x2c5   : > { %782 = dma.done.wait (!%p653_p8), %s521_s25, 32  }
 0x2c6   : > { %784 = vsyncadd (!%p653_p8), %s521_s25, 4294967264  ;;  %s530_s8 = scalar_lea.sflag [#allocation5], %s520_s12 }
 0x2c7   : > { %786 = dma.done.wait (!%p653_p8), %s530_s8, 32  }
 0x2c8   : > { %788 = vsyncadd (!%p653_p8), %s530_s8, 4294967264  ;;  %p18_p5 = scmp.ge.s32.totalorder %s864_s21, 4   ;;  %s1017_s15 = smov %s795_s16 }
 0x2c9   : > { %s1018_s16 = smov %s799_s17  ;;  %s1019_s17 = smov %s875_s24 }
 0x2ca   : > { %s1020_s18 = smov %s864_s21  ;;  %20 = sbr.rel (!%p18_p5) target bundleno = 5 (0x5), region = 92 }
 0x2d1   :  { %542 = vsyncpa [#allocation3], 1 }
 0x2d2   :  { %544 = vsyncpa [#allocation3 + $0x1], 1 }
 0x2d3   :  { %545 = vsyncpa [#allocation5], 1 }
 0x2d4   :  { %547 = vsyncpa [#allocation5 + $0x1], 1 }

</bundles_post_ra>
